<compile_context>
chip_gen: v5e
topology: v5e:2x2
jax: 0.10.0
libtpu: 0.0.40
codegen_flags: <defaults>
</compile_context>

<pallas_src>
import math
from functools import partial

import jax
import jax.numpy as jnp
from jax.experimental import pallas as pl
from jax.experimental.pallas import tpu as pltpu

_HALF_LOG_2PI = 0.5 * math.log(2.0 * math.pi)


def _cdiv(a, b):
    return (a + b - 1) // b


def _round_up(x, m):
    return _cdiv(x, m) * m


def _is_v7x():
    """True only on a dual-TensorCore chip (v7x); used to gate the grid>=2 split."""
    try:
        kind = jax.devices()[0].device_kind.lower().replace(" ", "")
    except Exception:
        return False
    return ("v7" in kind) or ("tpu7" in kind)


# ---------------------------------------------------------------------------
# Kernel
# ---------------------------------------------------------------------------
def _hetero_gaussian_kernel(z_ref, x_ref,
                            w1_ref, b1_ref,
                            w2_ref, b2_ref,
                            wmu_ref, bmu_ref,
                            ws_ref, bs_ref,
                            out_ref, *, min_sigma):
    # Two hidden layers with ReLU (f32 MXU accumulate).
    h = jnp.dot(z_ref[...], w1_ref[...], preferred_element_type=jnp.float32) + b1_ref[...]
    h = jnp.maximum(h, 0.0)
    h = jnp.dot(h, w2_ref[...], preferred_element_type=jnp.float32) + b2_ref[...]
    h = jnp.maximum(h, 0.0)

    # Heads (weights were split once at prepare_params time -> no in-kernel lane slicing).
    mu = jnp.dot(h, wmu_ref[...], preferred_element_type=jnp.float32) + bmu_ref[...]
    raw_sigma = jnp.dot(h, ws_ref[...], preferred_element_type=jnp.float32) + bs_ref[...]

    # sigma = softplus(raw_sigma) + min_sigma ; Normal(mu, sigma).log_prob(x)
    sigma = jax.nn.softplus(raw_sigma) + min_sigma
    inv_sigma = pl.reciprocal(sigma)          # exact reciprocal keeps the 2e-4 tolerance
    diff = (x_ref[...] - mu) * inv_sigma
    out_ref[...] = (-0.5 * diff * diff + jnp.log(inv_sigma) - _HALF_LOG_2PI
                    ).astype(out_ref.dtype)


# ---------------------------------------------------------------------------
# One-time parameter preparation (hoisted out of the per-call path)
# ---------------------------------------------------------------------------
def prepare_params(params, out_dim):
    """Cast to f32, reshape biases to (1, n), split the mu/sigma head. Call once at load time."""
    w1, b1, w2, b2, w3, b3 = params
    f32 = jnp.float32
    w3 = jnp.asarray(w3, f32)
    b3 = jnp.asarray(b3, f32).reshape(-1)
    return (
        jnp.asarray(w1, f32), jnp.asarray(b1, f32).reshape(1, -1),
        jnp.asarray(w2, f32), jnp.asarray(b2, f32).reshape(1, -1),
        w3[:, :out_dim], b3[:out_dim].reshape(1, -1),
        w3[:, out_dim:], b3[out_dim:].reshape(1, -1),
    )


# ---------------------------------------------------------------------------
# Forward wrapper
# ---------------------------------------------------------------------------
def nn_hetero_gaussian_log_prob(z, x, params, *, min_sigma=0.001, tile_b=None, tile_max=512):
    """Pallas forward of NNHeteroGaussian: Normal(mu, sigma).log_prob(x), shape [B, out_dim].

    `params` may be the raw 6-tuple (w1,b1,w2,b2,w3,b3) or the 8-tuple from prepare_params().
    """
    B, in_dim = z.shape
    out_dim = x.shape[-1]

    if len(params) == 6:
        params = prepare_params(params, out_dim)   # fallback; prefer preparing once at load time
    w1, b1, w2, b2, wmu, bmu, ws, bs = params
    h1 = w1.shape[1]
    h2 = w2.shape[1]

    f32 = jnp.float32
    z_f = z.astype(f32)
    x_f = x.astype(f32)

    # --- batch tiling: big tiles, minimal padding; split for dual-TC only on v7x ---
    if tile_b is not None:
        tile_b = max(8, _round_up(int(tile_b), 8))       # guard: sublane-divisible
        n_steps = _cdiv(B, tile_b)
    else:
        n_steps = max(1, _cdiv(B, tile_max))
        if n_steps < 2 and B > 8 and _is_v7x():
            n_steps = 2                                  # give both v7x TensorCores work
        tile_b = _round_up(_cdiv(B, n_steps), 8)
    B_p = tile_b * n_steps

    if B_p > B:                                          # pad only what the tiling needs
        z_f = jnp.pad(z_f, ((0, B_p - B), (0, 0)))
        x_f = jnp.pad(x_f, ((0, B_p - B), (0, 0)))

    grid = (n_steps,)
    kernel = partial(_hetero_gaussian_kernel, min_sigma=float(min_sigma))

    # Weights/biases are grid-invariant resident blocks (constant index map -> no re-DMA).
    # TODO(synk): for very wide hidden dims, single-buffer these (pl.Buffered(1)) or stage them
    # via pl.ANY + one copy so the resident-weight footprint is not double-buffered in VMEM.
    full = lambda arr: pl.BlockSpec(arr.shape, lambda i: (0, 0))

    # --- VMEM budget + cost hint ---
    param_bytes = 4 * (in_dim * h1 + h1 + h1 * h2 + h2 + h2 * 2 * out_dim + 2 * out_dim)
    io_tile_bytes = 4 * tile_b * (in_dim + 2 * out_dim)            # z, x, out blocks
    work_bytes = 4 * tile_b * (h1 + h2 + 2 * out_dim)              # intermediates
    vmem_est = 2 * param_bytes + 2 * io_tile_bytes + 2 * work_bytes
    vmem_limit = int(min(64 << 20, max(16 << 20, 2 * vmem_est)))

    cost = pl.CostEstimate(
        flops=2 * B_p * (in_dim * h1 + h1 * h2 + h2 * 2 * out_dim),
        transcendentals=4 * B_p * out_dim,
        bytes_accessed=4 * (B_p * (in_dim + 2 * out_dim)) + param_bytes,
    )

    out = pl.pallas_call(
        kernel,
        out_shape=jax.ShapeDtypeStruct((B_p, out_dim), jnp.float32),
        grid_spec=pltpu.PrefetchScalarGridSpec(
            num_scalar_prefetch=0,
            grid=grid,
            in_specs=[
                pl.BlockSpec((tile_b, in_dim), lambda i: (i, 0)),    # z tile (compact)
                pl.BlockSpec((tile_b, out_dim), lambda i: (i, 0)),   # x tile (compact)
                full(w1), full(b1),                                  # layer 1
                full(w2), full(b2),                                  # layer 2
                full(wmu), full(bmu),                                # mu head
                full(ws), full(bs),                                  # sigma head
            ],
            out_specs=pl.BlockSpec((tile_b, out_dim), lambda i: (i, 0)),
        ),
        compiler_params=pltpu.CompilerParams(
            dimension_semantics=("parallel",),
            vmem_limit_bytes=vmem_limit),
        cost_estimate=cost,
    )(z_f, x_f, w1, b1, w2, b2, wmu, bmu, ws, bs)

    return out[:B] if B_p > B else out


# ---------------------------------------------------------------------------
# Init / reference / self-test
# ---------------------------------------------------------------------------
def init_params(key, in_dim, out_dim, hidden_dims=(64, 64)):
    """Deterministic init mimicking PyTorch nn.Linear default (U(-1/sqrt(fan_in), ...))."""
    dims = [in_dim, *hidden_dims, 2 * out_dim]
    params = []
    for fan_in, fan_out in zip(dims[:-1], dims[1:]):
        key, kw, kb = jax.random.split(key, 3)
        bound = 1.0 / math.sqrt(fan_in)
        w = jax.random.uniform(kw, (fan_in, fan_out), jnp.float32, -bound, bound)
        b = jax.random.uniform(kb, (fan_out,), jnp.float32, -bound, bound)
        params.extend([w, b])
    return tuple(params)


def _reference(z, x, params, min_sigma=0.001):
    w1, b1, w2, b2, w3, b3 = params
    h = jnp.maximum(z @ w1 + b1, 0.0)
    h = jnp.maximum(h @ w2 + b2, 0.0)
    out = h @ w3 + b3
    out_dim = x.shape[-1]
    mu = out[..., :out_dim]
    sigma = jax.nn.softplus(out[..., out_dim:]) + min_sigma
    return (-(x - mu) ** 2 / (2.0 * sigma ** 2)
            - jnp.log(sigma) - 0.5 * math.log(2.0 * math.pi))


if __name__ == "__main__":
    in_dim, out_dim, hidden_dims = 32, 16, (64, 64)
    batch = 8
    min_sigma = 0.001

    key = jax.random.PRNGKey(0)
    kp, kz, kx = jax.random.split(key, 3)
    raw_params = init_params(kp, in_dim, out_dim, hidden_dims)
    params = prepare_params(raw_params, out_dim)     # one-time prep, outside the call path
    z = jax.random.normal(kz, (batch, in_dim), jnp.float32)
    x = jax.random.normal(kx, (batch, out_dim), jnp.float32)

    log_prob = nn_hetero_gaussian_log_prob(z, x, params, min_sigma=min_sigma)
    log_prob = jax.block_until_ready(log_prob)

    ref = _reference(z, x, raw_params, min_sigma)
    assert log_prob.shape == (batch, out_dim)
    assert jnp.allclose(log_prob, ref, atol=2e-4, rtol=2e-4)
    print("KERNEL_OK")
</pallas_src>

<mosaic_0001>
module attributes {stable_mosaic.version = 11 : i64} {
  func.func @_hetero_gaussian_kernel(%arg0: i32, %arg1: memref<8x32xf32, #tpu.memory_space<vmem>>, %arg2: memref<8x16xf32, #tpu.memory_space<vmem>>, %arg3: memref<32x64xf32, #tpu.memory_space<vmem>>, %arg4: memref<1x64xf32, #tpu.memory_space<vmem>>, %arg5: memref<64x64xf32, #tpu.memory_space<vmem>>, %arg6: memref<1x64xf32, #tpu.memory_space<vmem>>, %arg7: memref<64x16xf32, #tpu.memory_space<vmem>>, %arg8: memref<1x16xf32, #tpu.memory_space<vmem>>, %arg9: memref<64x16xf32, #tpu.memory_space<vmem>>, %arg10: memref<1x16xf32, #tpu.memory_space<vmem>>, %arg11: memref<8x16xf32, #tpu.memory_space<vmem>>) attributes {dimension_semantics = [#tpu.dimension_semantics<parallel>], iteration_bounds = array<i64: 1>, scalar_prefetch = 0 : i64, scratch_operands = 0 : i64, tpu.core_type = #tpu.core_type<tc>, window_params = [{transform_indices = @transform_0, window_bounds = array<i64: 8, 32>}, {transform_indices = @transform_1, window_bounds = array<i64: 8, 16>}, {pipeline_mode = #tpu.pipeline_mode<synchronous>, transform_indices = @transform_2, window_bounds = array<i64: 32, 64>}, {pipeline_mode = #tpu.pipeline_mode<synchronous>, transform_indices = @transform_3, window_bounds = array<i64: 1, 64>}, {pipeline_mode = #tpu.pipeline_mode<synchronous>, transform_indices = @transform_4, window_bounds = array<i64: 64, 64>}, {pipeline_mode = #tpu.pipeline_mode<synchronous>, transform_indices = @transform_5, window_bounds = array<i64: 1, 64>}, {pipeline_mode = #tpu.pipeline_mode<synchronous>, transform_indices = @transform_6, window_bounds = array<i64: 64, 16>}, {pipeline_mode = #tpu.pipeline_mode<synchronous>, transform_indices = @transform_7, window_bounds = array<i64: 1, 16>}, {pipeline_mode = #tpu.pipeline_mode<synchronous>, transform_indices = @transform_8, window_bounds = array<i64: 64, 16>}, {pipeline_mode = #tpu.pipeline_mode<synchronous>, transform_indices = @transform_9, window_bounds = array<i64: 1, 16>}, {transform_indices = @transform_10, window_bounds = array<i64: 8, 16>}]} {
    %c0 = arith.constant 0 : index
    %c0_0 = arith.constant 0 : index
    %0 = vector.load %arg1[%c0, %c0_0] : memref<8x32xf32, #tpu.memory_space<vmem>>, vector<8x32xf32>
    %c0_1 = arith.constant 0 : index
    %c0_2 = arith.constant 0 : index
    %1 = vector.load %arg3[%c0_1, %c0_2] : memref<32x64xf32, #tpu.memory_space<vmem>>, vector<32x64xf32>
    %cst = arith.constant dense<0.000000e+00> : vector<8x64xf32>
    %2 = tpu.matmul %0, %1, %cst {dimension_numbers = #tpu.dot_dimension_numbers<[1], [0], [0], [1], [0, 0, 1, 1], [], []>} : vector<8x32xf32>, vector<32x64xf32>, vector<8x64xf32> -> vector<8x64xf32>
    %c0_3 = arith.constant 0 : index
    %c0_4 = arith.constant 0 : index
    %3 = vector.load %arg4[%c0_3, %c0_4] : memref<1x64xf32, #tpu.memory_space<vmem>>, vector<1x64xf32>
    %4 = vector.broadcast %3 : vector<1x64xf32> to vector<8x64xf32>
    %5 = arith.addf %2, %4 : vector<8x64xf32>
    %cst_5 = arith.constant 0.000000e+00 : f32
    %6 = vector.broadcast %cst_5 : f32 to vector<8x64xf32>
    %7 = arith.maximumf %5, %6 : vector<8x64xf32>
    %c0_6 = arith.constant 0 : index
    %c0_7 = arith.constant 0 : index
    %8 = vector.load %arg5[%c0_6, %c0_7] : memref<64x64xf32, #tpu.memory_space<vmem>>, vector<64x64xf32>
    %cst_8 = arith.constant dense<0.000000e+00> : vector<8x64xf32>
    %9 = tpu.matmul %7, %8, %cst_8 {dimension_numbers = #tpu.dot_dimension_numbers<[1], [0], [0], [1], [0, 0, 1, 1], [], []>} : vector<8x64xf32>, vector<64x64xf32>, vector<8x64xf32> -> vector<8x64xf32>
    %c0_9 = arith.constant 0 : index
    %c0_10 = arith.constant 0 : index
    %10 = vector.load %arg6[%c0_9, %c0_10] : memref<1x64xf32, #tpu.memory_space<vmem>>, vector<1x64xf32>
    %11 = vector.broadcast %10 : vector<1x64xf32> to vector<8x64xf32>
    %12 = arith.addf %9, %11 : vector<8x64xf32>
    %cst_11 = arith.constant 0.000000e+00 : f32
    %13 = vector.broadcast %cst_11 : f32 to vector<8x64xf32>
    %14 = arith.maximumf %12, %13 : vector<8x64xf32>
    %c0_12 = arith.constant 0 : index
    %c0_13 = arith.constant 0 : index
    %15 = vector.load %arg7[%c0_12, %c0_13] : memref<64x16xf32, #tpu.memory_space<vmem>>, vector<64x16xf32>
    %cst_14 = arith.constant dense<0.000000e+00> : vector<8x16xf32>
    %16 = tpu.matmul %14, %15, %cst_14 {dimension_numbers = #tpu.dot_dimension_numbers<[1], [0], [0], [1], [0, 0, 1, 1], [], []>} : vector<8x64xf32>, vector<64x16xf32>, vector<8x16xf32> -> vector<8x16xf32>
    %c0_15 = arith.constant 0 : index
    %c0_16 = arith.constant 0 : index
    %17 = vector.load %arg8[%c0_15, %c0_16] : memref<1x16xf32, #tpu.memory_space<vmem>>, vector<1x16xf32>
    %18 = vector.broadcast %17 : vector<1x16xf32> to vector<8x16xf32>
    %19 = arith.addf %16, %18 : vector<8x16xf32>
    %c0_17 = arith.constant 0 : index
    %c0_18 = arith.constant 0 : index
    %20 = vector.load %arg9[%c0_17, %c0_18] : memref<64x16xf32, #tpu.memory_space<vmem>>, vector<64x16xf32>
    %cst_19 = arith.constant dense<0.000000e+00> : vector<8x16xf32>
    %21 = tpu.matmul %14, %20, %cst_19 {dimension_numbers = #tpu.dot_dimension_numbers<[1], [0], [0], [1], [0, 0, 1, 1], [], []>} : vector<8x64xf32>, vector<64x16xf32>, vector<8x16xf32> -> vector<8x16xf32>
    %c0_20 = arith.constant 0 : index
    %c0_21 = arith.constant 0 : index
    %22 = vector.load %arg10[%c0_20, %c0_21] : memref<1x16xf32, #tpu.memory_space<vmem>>, vector<1x16xf32>
    %23 = vector.broadcast %22 : vector<1x16xf32> to vector<8x16xf32>
    %24 = arith.addf %21, %23 : vector<8x16xf32>
    %cst_22 = arith.constant 0.000000e+00 : f32
    %25 = vector.broadcast %cst_22 : f32 to vector<8x16xf32>
    %26 = arith.maximumf %24, %25 : vector<8x16xf32>
    %27 = vector.broadcast %cst_22 : f32 to vector<8x16xf32>
    %28 = arith.subf %24, %27 : vector<8x16xf32>
    %29 = arith.cmpf one, %28, %28 : vector<8x16xf32>
    %30 = vector.broadcast %cst_22 : f32 to vector<8x16xf32>
    %31 = arith.addf %24, %30 : vector<8x16xf32>
    %32 = math.absf %28 : vector<8x16xf32>
    %cst_23 = arith.constant 0.000000e+00 : f32
    %33 = vector.broadcast %cst_23 : f32 to vector<8x16xf32>
    %34 = arith.subf %33, %32 : vector<8x16xf32>
    %35 = math.exp %34 : vector<8x16xf32>
    %36 = math.log1p %35 : vector<8x16xf32>
    %37 = arith.addf %26, %36 : vector<8x16xf32>
    %38 = arith.select %29, %31, %37 : vector<8x16xi1>, vector<8x16xf32>
    %cst_24 = arith.constant 1.000000e-03 : f32
    %39 = vector.broadcast %cst_24 : f32 to vector<8x16xf32>
    %40 = arith.addf %38, %39 : vector<8x16xf32>
    %41 = tpu.reciprocal %40 : vector<8x16xf32> -> vector<8x16xf32>
    %c0_25 = arith.constant 0 : index
    %c0_26 = arith.constant 0 : index
    %42 = vector.load %arg2[%c0_25, %c0_26] : memref<8x16xf32, #tpu.memory_space<vmem>>, vector<8x16xf32>
    %43 = arith.subf %42, %19 : vector<8x16xf32>
    %44 = arith.mulf %43, %41 : vector<8x16xf32>
    %cst_27 = arith.constant -5.000000e-01 : f32
    %45 = vector.broadcast %cst_27 : f32 to vector<8x16xf32>
    %46 = arith.mulf %45, %44 : vector<8x16xf32>
    %47 = arith.mulf %46, %44 : vector<8x16xf32>
    %48 = math.log %41 : vector<8x16xf32>
    %49 = arith.addf %47, %48 : vector<8x16xf32>
    %cst_28 = arith.constant 0.918938517 : f32
    %50 = vector.broadcast %cst_28 : f32 to vector<8x16xf32>
    %51 = arith.subf %49, %50 : vector<8x16xf32>
    %c0_29 = arith.constant 0 : index
    %c0_30 = arith.constant 0 : index
    %52 = vector.load %arg11[%c0_29, %c0_30] : memref<8x16xf32, #tpu.memory_space<vmem>>, vector<8x16xf32>
    tpu.vector_store %arg11[%c0_29, %c0_30], %51 {strides = array<i32>} : memref<8x16xf32, #tpu.memory_space<vmem>>, vector<8x16xf32>,
    return
  }
  func.func @transform_0(%arg0: i32) -> (i32, i32) {
    %c0_i32 = arith.constant 0 : i32
    %c0_i32_0 = arith.constant 0 : i32
    return %arg0, %c0_i32 : i32, i32
  }
  func.func @transform_1(%arg0: i32) -> (i32, i32) {
    %c0_i32 = arith.constant 0 : i32
    %c0_i32_0 = arith.constant 0 : i32
    return %arg0, %c0_i32 : i32, i32
  }
  func.func @transform_2(%arg0: i32) -> (i32, i32) {
    %c0_i32 = arith.constant 0 : i32
    %c0_i32_0 = arith.constant 0 : i32
    %c0_i32_1 = arith.constant 0 : i32
    return %c0_i32, %c0_i32_0 : i32, i32
  }
  func.func @transform_3(%arg0: i32) -> (i32, i32) {
    %c0_i32 = arith.constant 0 : i32
    %c0_i32_0 = arith.constant 0 : i32
    %c0_i32_1 = arith.constant 0 : i32
    return %c0_i32, %c0_i32_0 : i32, i32
  }
  func.func @transform_4(%arg0: i32) -> (i32, i32) {
    %c0_i32 = arith.constant 0 : i32
    %c0_i32_0 = arith.constant 0 : i32
    %c0_i32_1 = arith.constant 0 : i32
    return %c0_i32, %c0_i32_0 : i32, i32
  }
  func.func @transform_5(%arg0: i32) -> (i32, i32) {
    %c0_i32 = arith.constant 0 : i32
    %c0_i32_0 = arith.constant 0 : i32
    %c0_i32_1 = arith.constant 0 : i32
    return %c0_i32, %c0_i32_0 : i32, i32
  }
  func.func @transform_6(%arg0: i32) -> (i32, i32) {
    %c0_i32 = arith.constant 0 : i32
    %c0_i32_0 = arith.constant 0 : i32
    %c0_i32_1 = arith.constant 0 : i32
    return %c0_i32, %c0_i32_0 : i32, i32
  }
  func.func @transform_7(%arg0: i32) -> (i32, i32) {
    %c0_i32 = arith.constant 0 : i32
    %c0_i32_0 = arith.constant 0 : i32
    %c0_i32_1 = arith.constant 0 : i32
    return %c0_i32, %c0_i32_0 : i32, i32
  }
  func.func @transform_8(%arg0: i32) -> (i32, i32) {
    %c0_i32 = arith.constant 0 : i32
    %c0_i32_0 = arith.constant 0 : i32
    %c0_i32_1 = arith.constant 0 : i32
    return %c0_i32, %c0_i32_0 : i32, i32
  }
  func.func @transform_9(%arg0: i32) -> (i32, i32) {
    %c0_i32 = arith.constant 0 : i32
    %c0_i32_0 = arith.constant 0 : i32
    %c0_i32_1 = arith.constant 0 : i32
    return %c0_i32, %c0_i32_0 : i32, i32
  }
  func.func @transform_10(%arg0: i32) -> (i32, i32) {
    %c0_i32 = arith.constant 0 : i32
    %c0_i32_0 = arith.constant 0 : i32
    return %arg0, %c0_i32 : i32, i32
  }
}

</mosaic_0001>

<bundles_post_ra>
// kernel: tpu_custom_call.1
= control target key start
LH: loop header
LB: loop body
LE: loop exit
PB: predicated region body
PF: predicated region fallthrough
CT: control target
= control target key end

     0   :  { %vm45_vm0 = vcmask 261120   ;;  %s442_s0 = inlined_call_operand.vmem [shape: f32[8,32], index: 0, kind: input, shape index: {}]   ;;  %s443_s1 = inlined_call_operand.vmem [shape: f32[8,16], index: 1, kind: input, shape index: {}]   ;;  %s444_s2 = inlined_call_operand.vmem [shape: f32[32,64], index: 2, kind: input, shape index: {}]   ;;  %s445_s3 = inlined_call_operand.vmem [shape: f32[1,64], index: 3, kind: input, shape index: {}]   ;;  %s446_s4 = inlined_call_operand.vmem [shape: f32[64,64], index: 4, kind: input, shape index: {}]   ;;  %s447_s5 = inlined_call_operand.vmem [shape: f32[1,64], index: 5, kind: input, shape index: {}]   ;;  %s448_s6 = inlined_call_operand.vmem [shape: f32[64,16], index: 6, kind: input, shape index: {}]   ;;  %s449_s7 = inlined_call_operand.vmem [shape: f32[1,16], index: 7, kind: input, shape index: {}]   ;;  %s450_s8 = inlined_call_operand.vmem [shape: f32[64,16], index: 8, kind: input, shape index: {}]   ;;  %s451_s9 = inlined_call_operand.vmem [shape: f32[1,16], index: 9, kind: input, shape index: {}]   ;;  %s452_s10 = inlined_call_operand.hbm [shape: f32[8,16], index: 10, kind: output, shape index: {}]  }
   0x1   :  { %v40_v0 = vld [vmem:[%s444_s2 + $0x18] sm:$0xff]  ;;  %v39_v1 = vld [vmem:[%s444_s2 + $0x10] sm:$0xff]  ;;  %v38_v3 = vld [vmem:[%s444_s2 + $0x8] sm:$0xff] }
   0x2   :  { %61 = vmatpush.msra.mxu0 %v40_v0  ;;  %v77_v2 = vld [vmem:[%s446_s4 + $0x38] sm:$0xff]  ;;  %v76_v4 = vld [vmem:[%s446_s4 + $0x30] sm:$0xff]  ;;  %v37_v5 = vld [vmem:[%s444_s2] sm:$0xff] }
   0x3   :  { %94 = vmatpush.msra.mxu1 %v77_v2  ;;  %v75_v6 = vld [vmem:[%s446_s4 + $0x28] sm:$0xff]  ;;  %v36_v7 = vld [vmem:[%s442_s0] sm:$0xff] }
   0x4   :  { %62 = vmatpush.msra.mxu0 %v39_v1  ;;  %v74_v8 = vld [vmem:[%s446_s4 + $0x20] sm:$0xff] }
   0x5   :  { %95 = vmatpush.msra.mxu1 %v76_v4 }
   0x6   :  { %63 = vmatpush.msra.mxu0 %v38_v3 }
   0x7   :  { %15 = vsyncpa [#allocation3], 0  ;;  %96 = vmatpush.msra.mxu1 %v75_v6  ;;  %v73_v9 = vld [vmem:[%s446_s4 + $0x18] sm:$0xff]  ;;  %v72_v10 = vld [vmem:[%s446_s4 + $0x10] sm:$0xff]  ;;  %vm82_vm1 = vcmask 523264   ;;  %vm216_vm8 = vcmask 130048  }
   0x8   :  { %64 = vmatpush.msra.mxu0 %v37_v5  ;;  %v71_v11 = vld [vmem:[%s446_s4 + $0x8] sm:$0xff]  ;;  %v70_v12 = vld [vmem:[%s446_s4] sm:$0xff]  ;;  %v114_v13 = vld [vmem:[%s448_s6 + $0x38] sm:$0xff] }
   0x9   :  { %234 = vmatmul.msk.f32.vlgmr.msra.gmra.mxu0 %vm45_vm0, %v36_v7  ;;  %97 = vmatpush.msra.mxu1 %v74_v8  ;;  %v149_v14 = vld [vmem:[%s450_s8 + $0x38] sm:$0xff]  ;;  %v113_v15 = vld [vmem:[%s448_s6 + $0x30] sm:$0xff]  ;;  %v112_v17 = vld [vmem:[%s448_s6 + $0x28] sm:$0xff] }
   0xa   :  { %130 = vmatpush.msra.mxu2 %v114_v13  ;;  %162 = vmatpush.msra.mxu3 %v149_v14  ;;  %v148_v16 = vld [vmem:[%s450_s8 + $0x30] sm:$0xff]  ;;  %v147_v18 = vld [vmem:[%s450_s8 + $0x28] sm:$0xff]  ;;  %v111_v19 = vld [vmem:[%s448_s6 + $0x20] sm:$0xff] }
   0xb   :  { %98 = vmatpush.msra.mxu1 %v73_v9  ;;  %v146_v20 = vld [vmem:[%s450_s8 + $0x20] sm:$0xff]  ;;  %v110_v21 = vld [vmem:[%s448_s6 + $0x18] sm:$0xff]  ;;  %v109_v27 = vld [vmem:[%s448_s6 + $0x10] sm:$0xff] }
   0xc   :  { %131 = vmatpush.msra.mxu2 %v113_v15  ;;  %163 = vmatpush.msra.mxu3 %v148_v16  ;;  %v145_v22 = vld [vmem:[%s450_s8 + $0x18] sm:$0xff]  ;;  %v240_v23 = vld [vmem:[%s445_s3] ss:$0 sm:$0xff]  ;;  %v144_v28 = vld [vmem:[%s450_s8 + $0x10] sm:$0xff] }
   0xd   :  { %99 = vmatpush.msra.mxu1 %v72_v10  ;;  %v108_v29 = vld [vmem:[%s448_s6 + $0x8] sm:$0xff]  ;;  %v107_v31 = vld [vmem:[%s448_s6] sm:$0xff] }
   0xe   :  { %132 = vmatpush.msra.mxu2 %v112_v17  ;;  %164 = vmatpush.msra.mxu3 %v147_v18  ;;  %v143_v30 = vld [vmem:[%s450_s8 + $0x8] sm:$0xff]  ;;  %v142_v32 = vld [vmem:[%s450_s8] sm:$0xff] }
   0xf   :  { %100 = vmatpush.msra.mxu1 %v71_v11  ;;  %v241_v33 = vld [vmem:[%s447_s5] ss:$0 sm:$0xff] }
  0x10   :  { %133 = vmatpush.msra.mxu2 %v111_v19  ;;  %165 = vmatpush.msra.mxu3 %v146_v20  ;;  %v243_v37 = vld [vmem:[%s451_s9] ss:$0 sm:$0xff] }
  0x11   :  { %101 = vmatpush.msra.mxu1 %v70_v12  ;;  %v242_v57 = vld [vmem:[%s449_s7] ss:$0 sm:$0xff]  ;;  %s278_s7 = smov [#allocation2]  }
  0x12   :  { %134 = vmatpush.msra.mxu2 %v110_v21  ;;  %166 = vmatpush.msra.mxu3 %v145_v22  ;;  %v207_v1 = vld [vmem:[%s443_s1] sm:$0xff]  ;;  %s223_s30 = sshll.u32 %s278_s7, 4  ;;  %s225_s1 = sshll.u32 %s452_s10, 4  ;;  %s224_s30 = int_to_ptr.vmem [resolvable:$true] %s223_s30  ;;  %s226_s1 = int_to_ptr.hbm [resolvable:$true] %s225_s1 }
  0x14   :  { %135 = vmatpush.msra.mxu2 %v109_v27  ;;  %167 = vmatpush.msra.mxu3 %v144_v28 }
  0x16   :  { %136 = vmatpush.msra.mxu2 %v108_v29  ;;  %168 = vmatpush.msra.mxu3 %v143_v30 }
  0x18   :  { %137 = vmatpush.msra.mxu2 %v107_v31  ;;  %169 = vmatpush.msra.mxu3 %v142_v32 }
  0x86   :  { %v66_v24 = vpop.f32.mrf.mxu0 }
  0x87   :  { %v67_v25 = vadd.f32 %v240_v23, %v66_v24 }
  0x89   :  { %v69_v26 = vmax.f32 %v67_v25, 0.0 }
  0x8b   :  { %235 = vmatmul.msk.f32.vlgmr.msra.gmra.mxu1 %vm82_vm1, %v69_v26 }
 0x108   :  { %v103_v34 = vpop.f32.mrf.mxu1 }
 0x109   :  { %v104_v35 = vadd.f32 %v241_v33, %v103_v34 }
 0x10b   :  { %v106_v36 = vmax.f32 %v104_v35, 0.0 }
 0x10d   :  { %236 = vmatmul.msk.f32.vlgmr.msra.gmra.mxu2 %vm82_vm1, %v106_v36  ;;  %237 = vmatmul.msk.f32.vlgmr.msra.gmra.mxu3 %vm82_vm1, %v106_v36 }
 0x190   :  { %v171_v38 = vpop.f32.mrf.mxu3  ;;  %v139_v59 = vpop.f32.mrf.mxu2 }
 0x191   :  { %v172_v39 = vadd.f32 %v243_v37, %v171_v38  ;;  %v140_v62 = vadd.f32 %v242_v57, %v139_v59 }
 0x193   :  { %v177_v40 = vand.u32 2147483647, %v172_v39  ;;  %v174_v51 = vmax.f32 %v172_v39, 0.0  ;;  %vm175_vm3 = vcmp.ne.f32.partialorder %v172_v39, %v172_v39  ;;  %v208_v4 = vsub.f32 %v207_v1, %v140_v62 }
 0x195   :  { %v178_v41 = vsub.f32 0.0, %v177_v40 }
 0x197   :  { %v179_v42 = vmul.f32 1.442695, %v178_v41 }
 0x199   :  { %244 = vpow2.f32 %v179_v42 }
 0x19f   :  { %v245_v43 = vpop.eup %244 }
 0x1a0   :  { %v181_v44 = vadd.f32 1.0, %v245_v43  ;;  %v184_v45 = vmul.f32 -0.5, %v245_v43  ;;  %v187_v47 = vand.u32 2147483647, %v245_v43 }
 0x1a2   :  { %246 = vlog2.f32 %v181_v44  ;;  %v185_v46 = vadd.f32 1.0, %v184_v45  ;;  %vm188_vm2 = vcmp.lt.f32.partialorder %v187_v47, 0.0004427343 }
 0x1a4   :  { %v186_v50 = vmul.f32 %v245_v43, %v185_v46 }
 0x1a8   :  { %v247_v48 = vpop.eup %246 }
 0x1a9   :  { %v183_v49 = vmul.f32 0.6931472, %v247_v48 }
 0x1ab   :  { %v189_v52 = vsel %vm188_vm2, %v186_v50, %v183_v49 }
 0x1ac   :  { %v190_v53 = vadd.f32 %v189_v52, %v174_v51 }
 0x1ae   :  { %v191_v54 = vsel %vm175_vm3, %v172_v39, %v190_v53 }
 0x1af   :  { %v192_v55 = vadd.f32 0.001, %v191_v54 }
 0x1b1   :  { %248 = vrcp.f32 %v192_v55  ;;  %v204_v61 = vand.u32 2147483648, %v192_v55  ;;  %v202_v0 = vand.u32 2147483647, %v192_v55  ;;  %vm198_vm5 = vweird.f32 %v192_v55 }
 0x1b3   :  { %v205_v3 = vor.u32 1.1754944e-38, %v204_v61  ;;  %vm203_vm7 = vcmp.eq.f32.partialorder %v202_v0, 8.507059e+37 }
 0x1b7   :  { %v249_v56 = vpop.eup %248 }
 0x1b8   :  { %v194_v58 = vmul.f32 %v249_v56, %v192_v55  ;;  %vm199_vm4 = vweird.f32 %v249_v56 }
 0x1b9   :  { %vm200_vm6 = vmor %vm198_vm5, %vm199_vm4 }
 0x1ba   :  { %v195_v60 = vsub.f32 1.0, %v194_v58 }
 0x1bc   :  { %v196_v63 = vmul.f32 %v249_v56, %v195_v60 }
 0x1be   :  { %v197_v2 = vadd.f32 %v249_v56, %v196_v63 }
 0x1c0   :  { %v201_v5 = vsel %vm200_vm6, %v249_v56, %v197_v2 }
 0x1c1   :  { %v206_v6 = vsel %vm203_vm7, %v205_v3, %v201_v5 }
 0x1c2   :  { %v209_v7 = vmul.f32 %v208_v4, %v206_v6  ;;  %250 = vlog2.f32 %v206_v6 }
 0x1c4   :  { %v210_v8 = vmul.f32 -0.5, %v209_v7 }
 0x1c6   :  { %v211_v10 = vmul.f32 %v210_v8, %v209_v7 }
 0x1c8   :  { %v251_v9 = vpop.eup %250 }
 0x1c9   :  { %v213_v11 = vmul.f32 0.6931472, %v251_v9 }
 0x1cb   :  { %v214_v12 = vadd.f32 %v213_v11, %v211_v10 }
 0x1cd   :  { %v238_v13 = vadd.f32 -0.9189385, %v214_v12 }
 0x1cf   :  { %217 = vst.msk [vmem:[#allocation2] sm:$0xff] %vm216_vm8, %v238_v13 }
 0x1d0   :  { %228 = dma.vmem_to_hbm [thread:$0]  %s224_s30, 128, %s226_s1, [#allocation3]  }
 0x1d1   :  { %276 = dma.done.wait [#allocation3], 128  }
 0x1d2   :  { %277 = vsyncadd [#allocation3], 4294967168 }
 0x1d3   :  { %233 = vsyncpa [#allocation3], 1 }

</bundles_post_ra>
